<compile_context>
chip_gen: v7x
topology: tpu7x:2x2x1
jax: 0.10.0
libtpu: 0.0.40
codegen_flags: <defaults>
</compile_context>

<pallas_src>
import functools

import jax
import jax.numpy as jnp
from jax import lax
from jax.experimental import pallas as pl
from jax.experimental.pallas import tpu as pltpu


def _round_up(x, m):
    return (x + m - 1) // m * m


def _gumbel_softmax_kernel(*refs, eps, ste, noise_disable, internal_noise):
    """One (TB, Npad) batch tile.  pi_ref is the (1, Npad) resident row
    (already log-softmaxed + pad-masked in the wrapper)."""
    if noise_disable:
        pi_ref, out_ref = refs
        s = pi_ref[...].astype(jnp.float32)                 # (1, Npad): g = 0, t = 1
    else:
        temp_ref, u_ref, pi_ref, out_ref = refs
        x = pi_ref[...].astype(jnp.float32)                 # (1, Npad), resident
        inv_t = 1.0 / temp_ref[0]                           # one scalar reciprocal
        u = u_ref[...]
        if internal_noise:
            # u is bf16 in (0,1]: both logs stay on the bf16 EUP path (v6e/v7x),
            # inner +eps dropped (u > 0), upcast only after the transcendentals.
            g = -jnp.log(-jnp.log(u) + jnp.asarray(eps, u.dtype))
            g = g.astype(jnp.float32)
        else:
            uf = u.astype(jnp.float32)
            g = -jnp.log(-jnp.log(uf + eps) + eps)          # matches the torch formula
        s = (x + g) * inv_t                                 # broadcast x over batch rows

    if ste:
        # Forward value of p + (onehot(argmax p) - p).detach() is the one-hot itself,
        # and argmax(softmax(s)) == argmax(s): skip the softmax entirely.
        n = s.shape[-1]
        iota = lax.broadcasted_iota(jnp.int32, s.shape, 1)
        s_max = jnp.max(s, axis=-1, keepdims=True)
        first = jnp.min(jnp.where(s == s_max, iota, n), axis=-1, keepdims=True)
        p = jnp.where(iota == first, 1.0, 0.0)
    else:
        s_max = jnp.max(s, axis=-1, keepdims=True)
        es = jnp.exp(s - s_max)
        denom = jnp.sum(es, axis=-1, keepdims=True)
        inv = pl.reciprocal(denom, approx=True)
        inv = inv * (2.0 - denom * inv)                     # one Newton step -> ~f32 accuracy
        p = es * inv

    out_ref[...] = p.astype(out_ref.dtype)


def gumbel_softmax(pi, temperature, batch_size=1, noise_disable=False, *,
                   ste=False, log_softmax_enable=True, eps=1e-6,
                   seed=0, u=None, out_dtype=jnp.float32):
    """Pallas TPU implementation of GumbelSoftmax.forward.

    If `u` (shape (batch_size, pi.size), uniform in [0,1)) is given, it is used as the
    noise sample (reproducible vs. a JAX/PyTorch-style reference).  Otherwise bf16
    uniforms in (0,1] are generated from `seed` in the wrapper (different random stream).
    """
    pi = jnp.asarray(pi, jnp.float32)
    n = int(pi.size)
    n_pad = _round_up(n, 128)
    batch = int(max(batch_size, 1))

    # ---- hoisted, tiny (1, n) preprocessing -------------------------------------
    x = pi.reshape(1, n)
    if log_softmax_enable:
        x = jax.nn.log_softmax(x, axis=-1)
    if n_pad != n:
        # pad lanes get a huge negative logit -> exp underflows to 0 in the kernel
        x = jnp.pad(x, ((0, 0), (0, n_pad - n)), constant_values=-1e30)

    # ---- noise-disabled fast path: one row, broadcast in the wrapper -------------
    if noise_disable:
        kernel = functools.partial(_gumbel_softmax_kernel, eps=float(eps), ste=bool(ste),
                                   noise_disable=True, internal_noise=False)
        row = pl.pallas_call(
            kernel,
            out_shape=jax.ShapeDtypeStruct((1, n_pad), out_dtype),
            grid=(1,),
            in_specs=[pl.BlockSpec((1, n_pad), lambda i: (0, 0))],
            out_specs=pl.BlockSpec((1, n_pad), lambda i: (0, 0)),
            compiler_params=pltpu.CompilerParams(
                dimension_semantics=("arbitrary",),
                vmem_limit_bytes=32 * 1024 * 1024),
        )(x)
        out = jnp.broadcast_to(row[:, :n], (batch, n))
        return out.reshape((batch, *pi.shape))

    # ---- noise path ---------------------------------------------------------------
    internal_noise = u is None
    u_elem_bytes = 2 if internal_noise else 4

    # Batch tiling: ~4 MiB (out + noise) tiles hit the HBM-roofline knee; cap 1024 rows.
    row_bytes = n_pad * (4 + u_elem_bytes)
    tb = max(1, (4 << 20) // row_bytes)
    if batch <= tb:
        if batch >= 16:
            tb = _round_up(-(-batch // 2), 8)   # >= 2 grid steps so both v7x TCs get work
        else:
            tb = batch                          # full-extent block (exempt from 8-row rule)
    else:
        tb = min(max(8, tb // 8 * 8), 1024)
    b_pad = _round_up(batch, tb)
    grid = (b_pad // tb,)

    # Untiled-N VMEM guard (double-buffered out + u tiles + resident pi row).
    tile_bytes = tb * n_pad * (4 + u_elem_bytes)
    if 2 * tile_bytes + 2 * n_pad * 4 > (28 << 20):
        # TODO(synk): tile N (two-pass / online softmax over N blocks) for very large pi
        raise NotImplementedError("pi too large for the untiled-N GumbelSoftmax kernel")

    if internal_noise:
        key = jax.random.PRNGKey(int(seed))
        u_arr = 1.0 - jax.random.uniform(key, (b_pad, n_pad), dtype=jnp.bfloat16)  # (0,1]
    else:
        u_arr = jnp.asarray(u, jnp.float32).reshape(batch, n)
        u_arr = jnp.pad(u_arr, ((0, b_pad - batch), (0, n_pad - n)),
                        constant_values=0.5)

    kernel = functools.partial(_gumbel_softmax_kernel, eps=float(eps), ste=bool(ste),
                               noise_disable=False, internal_noise=internal_noise)
    out = pl.pallas_call(
        kernel,
        out_shape=jax.ShapeDtypeStruct((b_pad, n_pad), out_dtype),
        grid=grid,
        in_specs=[
            pl.BlockSpec(memory_space=pltpu.SMEM),            # temperature scalar
            pl.BlockSpec((tb, n_pad), lambda i: (i, 0)),      # noise tile
            pl.BlockSpec((1, n_pad), lambda i: (0, 0)),       # resident pi row
        ],
        out_specs=pl.BlockSpec((tb, n_pad), lambda i: (i, 0)),
        compiler_params=pltpu.CompilerParams(
            dimension_semantics=("parallel",),                # batch split across TCs
            vmem_limit_bytes=32 * 1024 * 1024),
    )(jnp.asarray([temperature], jnp.float32), u_arr, x)

    out = out[:batch, :n]
    return out.reshape((batch, *pi.shape))


def _reference(pi, temperature, batch_size, noise_disable, u, *,
               log_softmax_enable=True, eps=1e-6):
    """Pure-JAX reference mirroring the PyTorch forward (given the same uniforms)."""
    n = pi.size
    x = pi.reshape(1, n).astype(jnp.float32)
    if log_softmax_enable:
        x = jax.nn.log_softmax(x, axis=-1)
    if noise_disable:
        g = jnp.zeros((batch_size, n), jnp.float32)
        t = 1.0
    else:
        g = -jnp.log(-jnp.log(u + eps) + eps)
        t = temperature
    s = (x + g) / t
    return jax.nn.softmax(s, axis=-1).reshape((batch_size, *pi.shape))


if __name__ == "__main__":
    key = jax.random.PRNGKey(0)
    k_pi, k_u, k_pi2, k_u2 = jax.random.split(key, 4)

    # pi plays the role of the HMQ search matrix; small deterministic shape.
    pi = jax.random.normal(k_pi, (4, 16, 16), dtype=jnp.float32)   # n = 1024
    batch, temp = 2, 0.5
    u = jax.random.uniform(k_u, (batch, pi.size), dtype=jnp.float32)

    # 1) noise path with external uniforms -> exact check vs reference
    out = gumbel_softmax(pi, temp, batch_size=batch, u=u)
    jax.block_until_ready(out)
    assert out.shape == (batch, 4, 16, 16)
    ref = _reference(pi, temp, batch, False, u)
    assert jnp.allclose(out, ref, atol=2e-5, rtol=1e-4)
    assert jnp.allclose(out.reshape(batch, -1).sum(-1), 1.0, atol=1e-4)

    # 2) noise disabled -> single-row kernel + wrapper broadcast
    out_nd = gumbel_softmax(pi, temp, batch_size=batch, noise_disable=True)
    jax.block_until_ready(out_nd)
    ref_nd = _reference(pi, temp, batch, True, u)
    assert out_nd.shape == (batch, 4, 16, 16)
    assert jnp.allclose(out_nd, ref_nd, atol=2e-5, rtol=1e-4)

    # 3) default path: wrapper-generated bf16 noise (different stream; statistical checks)
    out_gen = gumbel_softmax(pi, temp, batch_size=batch, seed=123)
    jax.block_until_ready(out_gen)
    assert out_gen.shape == (batch, 4, 16, 16)
    assert bool(jnp.all(jnp.isfinite(out_gen)))
    assert bool(jnp.all((out_gen >= 0.0) & (out_gen <= 1.0)))
    assert jnp.allclose(out_gen.reshape(batch, -1).sum(-1), 1.0, atol=1e-3)

    # 4) STE fast path: one-hot whose index is a maximizer of the reference softmax
    out_ste = gumbel_softmax(pi, temp, batch_size=batch, u=u, ste=True)
    jax.block_until_ready(out_ste)
    flat = out_ste.reshape(batch, -1)
    assert jnp.allclose(flat.sum(-1), 1.0) and jnp.allclose(flat.max(-1), 1.0)
    idx_k = jnp.argmax(flat, axis=-1)
    ref_flat = ref.reshape(batch, -1)
    ref_at_k = jnp.take_along_axis(ref_flat, idx_k[:, None], axis=-1)[:, 0]
    assert jnp.allclose(ref_at_k, ref_flat.max(-1), atol=1e-6)

    # 5) unaligned n (pad/mask path): pi (3,5,7) -> n = 105, batch 3
    pi2 = jax.random.normal(k_pi2, (3, 5, 7), dtype=jnp.float32)
    u2 = jax.random.uniform(k_u2, (3, pi2.size), dtype=jnp.float32)
    out2 = gumbel_softmax(pi2, 0.7, batch_size=3, u=u2)
    jax.block_until_ready(out2)
    assert out2.shape == (3, 3, 5, 7)
    ref2 = _reference(pi2, 0.7, 3, False, u2)
    assert jnp.allclose(out2, ref2, atol=2e-5, rtol=1e-4)
    assert jnp.allclose(out2.reshape(3, -1).sum(-1), 1.0, atol=1e-4)

    print("KERNEL_OK")
</pallas_src>

<mosaic_0001>
module attributes {stable_mosaic.version = 11 : i64} {
  func.func @_gumbel_softmax_kernel(%arg0: i32, %arg1: memref<1xf32, #tpu.memory_space<smem>>, %arg2: memref<2x1024xf32, #tpu.memory_space<vmem>>, %arg3: memref<1x1024xf32, #tpu.memory_space<vmem>>, %arg4: memref<2x1024xf32, #tpu.memory_space<vmem>>) attributes {dimension_semantics = [#tpu.dimension_semantics<parallel>], iteration_bounds = array<i64: 1>, scalar_prefetch = 0 : i64, scratch_operands = 0 : i64, tpu.core_type = #tpu.core_type<tc>, window_params = [{transform_indices = @transform_0, window_bounds = array<i64: 1>}, {transform_indices = @transform_1, window_bounds = array<i64: 2, 1024>}, {pipeline_mode = #tpu.pipeline_mode<synchronous>, transform_indices = @transform_2, window_bounds = array<i64: 1, 1024>}, {transform_indices = @transform_3, window_bounds = array<i64: 2, 1024>}]} {
    %c0 = arith.constant 0 : index
    %c0_0 = arith.constant 0 : index
    %0 = vector.load %arg3[%c0, %c0_0] : memref<1x1024xf32, #tpu.memory_space<vmem>>, vector<1x1024xf32>
    %c0_1 = arith.constant 0 : index
    %1 = memref.load %arg1[%c0_1] : memref<1xf32, #tpu.memory_space<smem>>
    %cst = arith.constant 1.000000e+00 : f32
    %2 = arith.divf %cst, %1 : f32
    %c0_2 = arith.constant 0 : index
    %c0_3 = arith.constant 0 : index
    %3 = vector.load %arg2[%c0_2, %c0_3] : memref<2x1024xf32, #tpu.memory_space<vmem>>, vector<2x1024xf32>
    %cst_4 = arith.constant 9.99999997E-7 : f32
    %4 = vector.broadcast %cst_4 : f32 to vector<2x1024xf32>
    %5 = arith.addf %3, %4 : vector<2x1024xf32>
    %6 = math.log %5 : vector<2x1024xf32>
    %cst_5 = arith.constant 0.000000e+00 : f32
    %7 = vector.broadcast %cst_5 : f32 to vector<2x1024xf32>
    %8 = arith.subf %7, %6 : vector<2x1024xf32>
    %cst_6 = arith.constant 9.99999997E-7 : f32
    %9 = vector.broadcast %cst_6 : f32 to vector<2x1024xf32>
    %10 = arith.addf %8, %9 : vector<2x1024xf32>
    %11 = math.log %10 : vector<2x1024xf32>
    %cst_7 = arith.constant 0.000000e+00 : f32
    %12 = vector.broadcast %cst_7 : f32 to vector<2x1024xf32>
    %13 = arith.subf %12, %11 : vector<2x1024xf32>
    %14 = vector.broadcast %0 : vector<1x1024xf32> to vector<2x1024xf32>
    %15 = arith.addf %14, %13 : vector<2x1024xf32>
    %16 = vector.broadcast %2 : f32 to vector<2x1024xf32>
    %17 = arith.mulf %15, %16 : vector<2x1024xf32>
    %cst_8 = arith.constant dense<0xFF800000> : vector<2xf32>
    %18 = vector.multi_reduction <maximumf>, %17, %cst_8 [1] : vector<2x1024xf32> to vector<2xf32>
    %19 = vector.shape_cast %18 : vector<2xf32> to vector<2x1xf32>
    %20 = vector.broadcast %19 : vector<2x1xf32> to vector<2x1024xf32>
    %21 = arith.subf %17, %20 : vector<2x1024xf32>
    %22 = math.exp %21 : vector<2x1024xf32>
    %cst_9 = arith.constant dense<0.000000e+00> : vector<2xf32>
    %23 = vector.multi_reduction <add>, %22, %cst_9 [1] : vector<2x1024xf32> to vector<2xf32>
    %24 = vector.shape_cast %23 : vector<2xf32> to vector<2x1xf32>
    %25 = tpu.reciprocal %24 {approx = true} : vector<2x1xf32> -> vector<2x1xf32>
    %26 = arith.mulf %24, %25 : vector<2x1xf32>
    %cst_10 = arith.constant 2.000000e+00 : f32
    %27 = vector.broadcast %cst_10 : f32 to vector<2x1xf32>
    %28 = arith.subf %27, %26 : vector<2x1xf32>
    %29 = arith.mulf %25, %28 : vector<2x1xf32>
    %30 = vector.broadcast %29 : vector<2x1xf32> to vector<2x1024xf32>
    %31 = arith.mulf %22, %30 : vector<2x1024xf32>
    %c0_11 = arith.constant 0 : index
    %c0_12 = arith.constant 0 : index
    %32 = vector.load %arg4[%c0_11, %c0_12] : memref<2x1024xf32, #tpu.memory_space<vmem>>, vector<2x1024xf32>
    tpu.vector_store %arg4[%c0_11, %c0_12], %31 {strides = array<i32>} : memref<2x1024xf32, #tpu.memory_space<vmem>>, vector<2x1024xf32>,
    return
  }
  func.func @transform_0(%arg0: i32) -> i32 {
    %c0_i32 = arith.constant 0 : i32
    %c0_i32_0 = arith.constant 0 : i32
    return %c0_i32 : i32
  }
  func.func @transform_1(%arg0: i32) -> (i32, i32) {
    %c0_i32 = arith.constant 0 : i32
    %c0_i32_0 = arith.constant 0 : i32
    return %arg0, %c0_i32 : i32, i32
  }
  func.func @transform_2(%arg0: i32) -> (i32, i32) {
    %c0_i32 = arith.constant 0 : i32
    %c0_i32_0 = arith.constant 0 : i32
    %c0_i32_1 = arith.constant 0 : i32
    return %c0_i32, %c0_i32_0 : i32, i32
  }
  func.func @transform_3(%arg0: i32) -> (i32, i32) {
    %c0_i32 = arith.constant 0 : i32
    %c0_i32_0 = arith.constant 0 : i32
    return %arg0, %c0_i32 : i32, i32
  }
}

</mosaic_0001>

<bundles_post_ra>
// kernel: tpu_custom_call.1
= control target key start
LH: loop header
LB: loop body
LE: loop exit
PB: predicated region body
PF: predicated region fallthrough
CT: control target
= control target key end

     0   :  { %9 = vsyncpa [#allocation4], 0  ;;  %s493_s0 = inlined_call_operand.<no memory space> [shape: f32[1], index: 0, kind: input, shape index: {}]   ;;  %s494_s1 = inlined_call_operand.hbm [shape: f32[2,1024], index: 1, kind: input, shape index: {}]   ;;  %s495_s2 = inlined_call_operand.hbm [shape: f32[1,1024], index: 2, kind: input, shape index: {}]   ;;  %s496_s3 = inlined_call_operand.hbm [shape: f32[2,1024], index: 3, kind: output, shape index: {}]  }
   0x1   :  { %10 = vsyncpa [#allocation7], 0 }
   0x2   :  { %11 = vsyncpa [#allocation5], 0  ;;  %s404_s12 = smov [#allocation3]   ;;  %s405_s14 = smov [#allocation6]  }
   0x3   :  { %s20_s13 = sshll.u32 %s404_s12, 4  ;;  %s30_s15 = sshll.u32 %s405_s14, 4  ;;  %s21_s13 = int_to_ptr.vmem [resolvable:$true] %s20_s13  ;;  %s31_s15 = int_to_ptr.vmem [resolvable:$true] %s30_s15 }
   0x4   :  { %s332_s18 = scalar_lea.hbm %s494_s1, 256 }
   0x5   :  { %p333_p0 = scmp.ne.s32.totalorder %s494_s1, %s332_s18  ;;  %p336_p1 = scmp.lt.u32.totalorder %s332_s18, %s494_s1 }
   0x7   :  { %p338_p2 = pnand %p336_p1, %p333_p0 }
   0x9   :  { %341 = shalt.err (!%p338_p2)
}
   0xa   :  { %s342_s23 = scalar_lea.vmem %s21_s13, 256  ;;  %p347_p4 = scmp.lt.s32.totalorder %s21_s13, %s21_s13 }
   0xb   :  { %p343_p3 = scmp.ne.s32.totalorder %s21_s13, %s342_s23  ;;  %p348_p5 = scmp.lt.s32.totalorder %s342_s23, %s342_s23 }
   0xd   :  { %p349_p6 = por %p348_p5, %p347_p4 }
   0xf   :  { %p350_p7 = pnand %p349_p6, %p343_p3 }
  0x11   :  { %353 = shalt.err (!%p350_p7)
}
  0x12   :  { %23 = dma.hbm_to_vmem [thread:$0]  %s494_s1, 256, %s21_s13, [#allocation4]  }
  0x13   :  { %s354_s28 = scalar_lea.hbm %s495_s2, 128 }
  0x14   :  { %p355_p8 = scmp.ne.s32.totalorder %s495_s2, %s354_s28  ;;  %p358_p9 = scmp.lt.u32.totalorder %s354_s28, %s495_s2 }
  0x16   :  { %p360_p10 = pnand %p358_p9, %p355_p8 }
  0x18   :  { %363 = shalt.err (!%p360_p10)
}
  0x19   :  { %s364_s6 = scalar_lea.vmem %s31_s15, 128  ;;  %p369_p12 = scmp.lt.s32.totalorder %s31_s15, %s31_s15 }
  0x1a   :  { %p365_p11 = scmp.ne.s32.totalorder %s31_s15, %s364_s6  ;;  %p370_p13 = scmp.lt.s32.totalorder %s364_s6, %s364_s6 }
  0x1c   :  { %p371_p0 = por %p370_p13, %p369_p12 }
  0x1e   :  { %p372_p1 = pnand %p371_p0, %p365_p11 }
  0x20   :  { %375 = shalt.err (!%p372_p1)
}
  0x21   :  { %33 = dma.hbm_to_vmem [thread:$0]  %s495_s2, 128, %s31_s15, [#allocation7]  }
  0x22   :  { %398 = dma.done.wait [#allocation4], 256  }
  0x23   :  { %399 = vsyncadd [#allocation4], 4294967040  ;;  %v42_v0 = vstv %s493_s0 }
  0x24   :  { %400 = dma.done.wait [#allocation7], 128  }
  0x25   :  { %401 = vsyncadd [#allocation7], 4294967168  ;;  %304 = vrcp.f32 %v42_v0  ;;  %v45_v1 = vld [vmem:[#allocation3] sm:$0xff]  ;;  %v46_v2 = vld [vmem:[#allocation3 + $0x8] sm:$0xff]  ;;  %v64_v17 = vlaneseq  ;;  %v406_v18 = vmov 1983009808  }
  0x26   :  { %v47_v3 = vadd.f32 1e-06, %v45_v1  ;;  %v48_v4 = vadd.f32 1e-06, %v46_v2  ;;  %v108_v19 = vunpack.c.l.s4 %v406_v18  ;;  %v40_v32 = vld [vmem:[#allocation6] sm:$0xff]  ;;  %vm165_vm0 = vcmask 1041408  }
  0x27   :  { %v65_v22 = vshrl.u32 %v64_v17, 7  ;;  %s407_s2 = smov [#allocation8]  }
  0x28   :  { %306 = vlog2.f32 %v47_v3  ;;  %v109_v23 = vunpack.c.0.s8 %v108_v19  ;;  %s288_s10 = sshll.u32 %s407_s2, 4  ;;  %s289_s10 = int_to_ptr.vmem [resolvable:$true] %s288_s10 }
  0x29   :  { %308 = vlog2.f32 %v48_v4  ;;  %v66_v28 = vsub.s32 0, %v65_v22  ;;  %v70_v29 = vsub.s32 1, %v65_v22  ;;  %v74_v30 = vsub.s32 2, %v65_v22  ;;  %s376_s11 = scalar_lea.vmem %s289_s10, 256  ;;  %p381_p3 = scmp.lt.s32.totalorder %s289_s10, %s289_s10 }
  0x2a   :  { %v455_v26 = vsub.s32 %v109_v23, %v65_v22  ;;  %v78_v31 = vsub.s32 3, %v65_v22  ;;  %v82_v33 = vsub.s32 4, %v65_v22  ;;  %v86_v34 = vsub.s32 5, %v65_v22  ;;  %p377_p2 = scmp.ne.s32.totalorder %s289_s10, %s376_s11  ;;  %p382_p4 = scmp.lt.s32.totalorder %s376_s11, %s376_s11 }
  0x2b   :  { %v90_v37 = vsub.s32 6, %v65_v22  ;;  %v94_v38 = vsub.s32 7, %v65_v22  ;;  %v67_v41 = vrot.slane %v40_v32, %v66_v28  ;;  %v71_v42 = vrot.slane %v40_v32, %v70_v29 }
  0x2c   :  { %v75_v43 = vrot.slane %v40_v32, %v74_v30  ;;  %v79_v44 = vrot.slane %v40_v32, %v78_v31  ;;  %v83_v45 = vrot.slane %v40_v32, %v82_v33  ;;  %v87_v46 = vrot.slane %v40_v32, %v86_v34  ;;  %p383_p5 = por %p382_p4, %p381_p3 }
  0x2d   :  { %v91_v49 = vrot.slane %v40_v32, %v90_v37  ;;  %v95_v50 = vrot.slane %v40_v32, %v94_v38 }
  0x2e   :  { %p384_p6 = pnand %p383_p5, %p377_p2 }
  0x2f   :  { %v305_v5 = vpop.eup %304 }
  0x30   :  { %298 = vpush %v305_v5 }
  0x32   :  { %v307_v6 = vpop.eup %306 }
  0x33   :  { %v309_v7 = vpop.eup %308  ;;  %v50_v8 = vmul.f32 0.6931472, %v307_v6 }
  0x34   :  { %v52_v9 = vmul.f32 0.6931472, %v309_v7 }
  0x35   :  { %v53_v10 = vsub.f32 0.0, %v50_v8 }
  0x36   :  { %v54_v11 = vsub.f32 0.0, %v52_v9 }
  0x37   :  { %v55_v12 = vadd.f32 1e-06, %v53_v10 }
  0x38   :  { %v56_v13 = vadd.f32 1e-06, %v54_v11 }
  0x39   :  { %310 = vlog2.f32 %v55_v12 }
  0x3a   :  { %312 = vlog2.f32 %v56_v13 }
  0x43   :  { %v311_v14 = vpop.eup %310 }
  0x44   :  { %v313_v15 = vpop.eup %312  ;;  %v58_v16 = vmul.f32 0.6931472, %v311_v14 }
  0x45   :  { %v60_v20 = vmul.f32 0.6931472, %v313_v15 }
  0x46   :  { %v61_v21 = vsub.f32 0.0, %v58_v16 }
  0x47   :  { %v62_v24 = vsub.f32 0.0, %v60_v20 }
  0x48   :  { %v106_v25 = vcombine.high %v61_v21, %v61_v21  ;;  %v113_v35 = vrot.slane %v61_v21, %v455_v26 }
  0x49   :  { %v123_v27 = vcombine.high %v62_v24, %v62_v24  ;;  %v130_v39 = vrot.slane %v62_v24, %v455_v26 }
  0x4a   :  { %v120_v36 = vrot.slane %v106_v25, %v455_v26  ;;  %v121_v47 = vcombine.high %v113_v35, %v113_v35  ;;  %v148_v53 = vadd.f32 %v113_v35, %v67_v41 }
  0x4b   :  { %v137_v40 = vrot.slane %v123_v27, %v455_v26  ;;  %v138_v51 = vcombine.high %v130_v39, %v130_v39  ;;  %v152_v57 = vadd.f32 %v130_v39, %v83_v45 }
  0x4c   :  { %v122_v48 = vcombine.high %v120_v36, %v120_v36  ;;  %v149_v54 = vadd.f32 %v121_v47, %v71_v42  ;;  %v150_v55 = vadd.f32 %v120_v36, %v75_v43 }
  0x4d   :  { %v139_v52 = vcombine.high %v137_v40, %v137_v40  ;;  %v153_v58 = vadd.f32 %v138_v51, %v87_v46  ;;  %v154_v59 = vadd.f32 %v137_v40, %v91_v49 }
  0x4e   :  { %v151_v56 = vadd.f32 %v122_v48, %v79_v44 }
  0x4f   :  { %v155_v60 = vadd.f32 %v139_v52, %v95_v50 }
  0x61   :  { %s299_s0 = spop %298 }
  0x62   :  { %v156_v61 = vstv %s299_s0 }
  0x63   :  { %v157_v62 = vmul.f32 %v156_v61, %v148_v53  ;;  %v158_v63 = vmul.f32 %v156_v61, %v149_v54  ;;  %v159_v0 = vmul.f32 %v156_v61, %v150_v55  ;;  %v160_v1 = vmul.f32 %v156_v61, %v151_v56 }
  0x64   :  { %v161_v2 = vmul.f32 %v156_v61, %v152_v57  ;;  %v162_v3 = vmul.f32 %v156_v61, %v153_v58  ;;  %v163_v4 = vmul.f32 %v156_v61, %v154_v59  ;;  %v164_v5 = vmul.f32 %v156_v61, %v155_v60 }
  0x65   :  { %v166_v6 = vsel %vm165_vm0, %v157_v62, -inf  ;;  %v167_v7 = vsel %vm165_vm0, %v158_v63, -inf  ;;  %v168_v8 = vsel %vm165_vm0, %v159_v0, -inf  ;;  %v169_v9 = vsel %vm165_vm0, %v160_v1, -inf }
  0x66   :  { %v170_v10 = vsel %vm165_vm0, %v161_v2, -inf  ;;  %v172_v11 = vsel %vm165_vm0, %v162_v3, -inf  ;;  %v174_v12 = vsel %vm165_vm0, %v163_v4, -inf  ;;  %v176_v13 = vsel %vm165_vm0, %v164_v5, -inf }
  0x67   :  { %v171_v14 = vmax.f32 %v166_v6, %v170_v10  ;;  %v173_v15 = vmax.f32 %v167_v7, %v172_v11  ;;  %v175_v16 = vmax.f32 %v168_v8, %v174_v12  ;;  %v177_v17 = vmax.f32 %v169_v9, %v176_v13 }
  0x69   :  { %v178_v18 = vmax.f32 %v171_v14, %v173_v15  ;;  %v179_v19 = vmax.f32 %v175_v16, %v177_v17 }
  0x6b   :  { %v180_v20 = vmax.f32 %v178_v18, %v179_v19 }
  0x6d   :  { %181 = vmax.xlane.f32.xlu0 %v180_v20 }
  0xfa   :  { %v182_v21 = vpop.xlane.xlu0 %181 }
  0xfb   :  { %v183_v22 = vsub.f32 %v157_v62, %v182_v21  ;;  %v184_v23 = vsub.f32 %v158_v63, %v182_v21  ;;  %v185_v24 = vsub.f32 %v159_v0, %v182_v21  ;;  %v186_v25 = vsub.f32 %v160_v1, %v182_v21 }
  0xfc   :  { %v187_v27 = vsub.f32 %v161_v2, %v182_v21  ;;  %v188_v32 = vsub.f32 %v162_v3, %v182_v21  ;;  %v189_v33 = vsub.f32 %v163_v4, %v182_v21  ;;  %v190_v35 = vsub.f32 %v164_v5, %v182_v21 }
  0xfd   :  { %v191_v28 = vmul.f32 1.442695, %v183_v22  ;;  %v193_v29 = vmul.f32 1.442695, %v184_v23  ;;  %v195_v30 = vmul.f32 1.442695, %v185_v24 }
  0xfe   :  { %v197_v31 = vmul.f32 1.442695, %v186_v25  ;;  %v199_v34 = vmul.f32 1.442695, %v187_v27  ;;  %v201_v36 = vmul.f32 1.442695, %v188_v32 }
  0xff   :  { %314 = vpow2.f32 %v191_v28  ;;  %v203_v37 = vmul.f32 1.442695, %v189_v33  ;;  %v205_v38 = vmul.f32 1.442695, %v190_v35 }
 0x100   :  { %316 = vpow2.f32 %v193_v29 }
 0x101   :  { %318 = vpow2.f32 %v195_v30 }
 0x102   :  { %320 = vpow2.f32 %v197_v31 }
 0x103   :  { %322 = vpow2.f32 %v199_v34 }
 0x104   :  { %324 = vpow2.f32 %v201_v36 }
 0x105   :  { %326 = vpow2.f32 %v203_v37 }
 0x106   :  { %328 = vpow2.f32 %v205_v38 }
 0x109   :  { %v315_v39 = vpop.eup %314 }
 0x10a   :  { %v317_v40 = vpop.eup %316  ;;  %v207_v41 = vsel %vm165_vm0, %v315_v39, 0.0 }
 0x10b   :  { %v319_v42 = vpop.eup %318  ;;  %v208_v43 = vsel %vm165_vm0, %v317_v40, 0.0 }
 0x10c   :  { %v321_v44 = vpop.eup %320  ;;  %v209_v45 = vadd.f32 %v208_v43, %v207_v41  ;;  %v210_v46 = vsel %vm165_vm0, %v319_v42, 0.0 }
 0x10d   :  { %v323_v47 = vpop.eup %322  ;;  %v212_v49 = vsel %vm165_vm0, %v321_v44, 0.0 }
 0x10e   :  { %v211_v48 = vadd.f32 %v210_v46, %v209_v45  ;;  %v325_v50 = vpop.eup %324  ;;  %v214_v52 = vsel %vm165_vm0, %v323_v47, 0.0 }
 0x10f   :  { %v327_v53 = vpop.eup %326  ;;  %v216_v55 = vsel %vm165_vm0, %v325_v50, 0.0 }
 0x110   :  { %v213_v51 = vadd.f32 %v212_v49, %v211_v48  ;;  %v329_v56 = vpop.eup %328  ;;  %v218_v58 = vsel %vm165_vm0, %v327_v53, 0.0 }
 0x111   :  { %v220_v60 = vsel %vm165_vm0, %v329_v56, 0.0 }
 0x112   :  { %v215_v54 = vadd.f32 %v214_v52, %v213_v51 }
 0x114   :  { %v217_v57 = vadd.f32 %v216_v55, %v215_v54 }
 0x116   :  { %v219_v59 = vadd.f32 %v218_v58, %v217_v57 }
 0x118   :  { %v221_v61 = vadd.f32 %v220_v60, %v219_v59 }
 0x11a   :  { %222 = vadd.xlane.f32.xlu0 %v221_v61 }
 0x1a7   :  { %v223_v62 = vpop.xlane.xlu0 %222 }
 0x1a8   :  { %330 = vrcp.f32 %v223_v62 }
 0x1b2   :  { %v331_v63 = vpop.eup %330 }
 0x1b3   :  { %v225_v0 = vmul.f32 %v331_v63, %v223_v62 }
 0x1b5   :  { %v226_v1 = vsub.f32 2.0, %v225_v0 }
 0x1b7   :  { %v227_v2 = vmul.f32 %v331_v63, %v226_v1 }
 0x1b9   :  { %v228_v3 = vmul.f32 %v315_v39, %v227_v2  ;;  %v229_v4 = vmul.f32 %v317_v40, %v227_v2  ;;  %v230_v5 = vmul.f32 %v319_v42, %v227_v2  ;;  %v231_v6 = vmul.f32 %v321_v44, %v227_v2 }
 0x1ba   :  { %v232_v7 = vmul.f32 %v323_v47, %v227_v2  ;;  %v233_v8 = vmul.f32 %v325_v50, %v227_v2  ;;  %v234_v9 = vmul.f32 %v327_v53, %v227_v2  ;;  %v235_v10 = vmul.f32 %v329_v56, %v227_v2 }
 0x1bb   :  { %v244_v11 = vcombine.low %v228_v3, %v229_v4  ;;  %v245_v12 = vcombine.low %v230_v5, %v231_v6 }
 0x1bc   :  { %v261_v13 = vcombine.low %v232_v7, %v233_v8  ;;  %v262_v14 = vcombine.low %v234_v9, %v235_v10 }
 0x1bd   :  { %v252_v15 = vrot.slane %v244_v11, %v455_v26  ;;  %v259_v16 = vrot.slane %v245_v12, %v455_v26 }
 0x1be   :  { %v269_v17 = vrot.slane %v261_v13, %v455_v26  ;;  %v276_v18 = vrot.slane %v262_v14, %v455_v26 }
 0x1bf   :  { %v260_v19 = vcombine.low %v252_v15, %v259_v16 }
 0x1c0   :  { %v277_v20 = vcombine.low %v269_v17, %v276_v18 }
 0x1c1   :  { %280 = vst [vmem:[#allocation8] sm:$0xff] %v260_v19 }
 0x1c2   :  { %281 = vst [vmem:[#allocation8 + $0x8] sm:$0xff] %v277_v20 }
 0x1c3   :  { %387 = shalt.err (!%p384_p6)
}
 0x1c4   :  { %s388_s14 = scalar_lea.hbm %s496_s3, 256 }
 0x1c5   :  { %p389_p7 = scmp.ne.s32.totalorder %s496_s3, %s388_s14  ;;  %p392_p8 = scmp.lt.u32.totalorder %s388_s14, %s496_s3 }
 0x1c7   :  { %p394_p9 = pnand %p392_p8, %p389_p7 }
 0x1c9   :  { %397 = shalt.err (!%p394_p9)
}
 0x1ca   :  { %291 = dma.vmem_to_hbm [thread:$0]  %s289_s10, 256, %s496_s3, [#allocation5]  }
 0x1cb   :  { %402 = dma.done.wait [#allocation5], 256  }
 0x1cc   :  { %403 = vsyncadd [#allocation5], 4294967040 }
 0x1cd   :  { %295 = vsyncpa [#allocation4], 1 }
 0x1ce   :  { %296 = vsyncpa [#allocation7], 1 }
 0x1cf   :  { %297 = vsyncpa [#allocation5], 1 }

</bundles_post_ra>
